<compile_context>
chip_gen: v6e
topology: v6e:2x2x1
jax: 0.10.0
libtpu: 0.0.40
codegen_flags: <defaults>
</compile_context>

<pallas_src>
import math
import functools
import numpy as np
import jax
import jax.numpy as jnp
from jax import lax
from jax.experimental import pallas as pl
from jax.experimental.pallas import tpu as pltpu  # noqa: F401  (TPU backend)

# ---------------- synthetic BFM configuration ----------------
GRID_H = GRID_W = 16
NV = GRID_H * GRID_W                      # number of vertices (3*NV = 768)
N_ID, N_EX, N_TEX = 80, 64, 80
N_PARAMS = 258                            # 80+64+80+3+27+3+1
N_KP = 68
IMG_SIZE = 64

NFP = 512                                 # faces padded 450 -> 512 (lane aligned)
SHAPE_K = 448                             # 3*(80+64)+3 = 435 -> 448
TEX_K = 256                               # 3*80+3      = 243 -> 256
LMK_PAD = 128                             # keypoints padded 68 -> 128

# loss weights (parser.*) -- deterministic constants
W_FEAT, W_COLOR, W_REG, W_GAMMA, W_LM, W_REFLC = 0.2, 1.92, 3e-4, 10.0, 1.6e-3, 5.0
W_ID, W_EXP, W_TEX = 1.0, 0.8, 1.7e-2

# spherical-harmonics constants (same as in the PyTorch module)
A0 = math.pi
A1 = 2.0 * math.pi / math.sqrt(3.0)
A2 = 2.0 * math.pi / math.sqrt(8.0)
C0 = 1.0 / math.sqrt(4.0 * math.pi)
C1 = math.sqrt(3.0) / math.sqrt(4.0 * math.pi)
C2 = 3.0 * math.sqrt(5.0) / math.sqrt(12.0 * math.pi)


# ---------------- the single fused Pallas kernel ----------------
def _bfm_fused_kernel(emit_mesh, *refs):
    if emit_mesh:
        (rcoef_ref, sblk_ref, acoef_ref, tblk_ref, sedge_ref, adj_ref,
         kp_ref, rowk_ref, gt_ref, params_ref, skin_ref,
         loss_ref, final_ref, color_ref) = refs
    else:
        (rcoef_ref, sblk_ref, acoef_ref, tblk_ref,
         kp_ref, rowk_ref, gt_ref, params_ref, skin_ref,
         loss_ref) = refs

    rows = rcoef_ref.shape[0]          # 3 * bs
    bs = rows // 3
    f32 = jnp.float32

    def roll_c(x, n):
        # row (c*bs + b)  <-  row (((c+n) % 3)*bs + b)   (static sublane slice+concat,
        # replaces the former K=3bs permutation matmuls on the MXU)
        s = n * bs
        return jnp.concatenate([x[s:], x[:s]], axis=0)

    rcoef = rcoef_ref[...]                                                        # bf16 [3bs, 448]

    # -- shape decode (z-flip, mean and per-batch rotation folded into rcoef/sblk) --
    vr = jnp.dot(rcoef, sblk_ref[...], preferred_element_type=f32)                # [3bs, NV] f32
    # -- albedo decode ( == texture/255, mean folded ) --
    alb = jnp.dot(acoef_ref[...], tblk_ref[...], preferred_element_type=f32)      # [3bs, NV] f32

    rowk = rowk_ref[...]
    k = lambda j: rowk[:, j:j + 1]     # per-row scalars

    # -- pose: (1 + scale) * rotated + translation --
    final = k(10) * vr + k(11)                                                    # [3bs, NV]

    # -- landmarks: keypoint selection matmul (f32) + 2D projection + SmoothL1 --
    lmk = jnp.dot(final, kp_ref[...].astype(f32), preferred_element_type=f32)     # [3bs, 128]
    lmk2d = k(12) * lmk * 125.0 + 125.0        # x: (x+1)*125 ; y: 250-(y+1)*125
    ri = lax.broadcasted_iota(jnp.int32, lmk2d.shape, 0)
    ci = lax.broadcasted_iota(jnp.int32, lmk2d.shape, 1)
    lmask = jnp.logical_and(ri < 2 * bs, ci < N_KP).astype(f32)
    d = (lmk2d - gt_ref[...]) * lmask
    ad = jnp.abs(d)
    sl1 = jnp.where(ad < 1.0, 0.5 * d * d, ad - 0.5)
    lmk_loss = jnp.sum(sl1, axis=(0, 1), keepdims=True) / float(bs * N_KP * 2)

    # -- coefficient regularization + gamma smoothness (from the raw params) --
    p = params_ref[...]                                                           # [bs, 258] f32
    li = lax.broadcasted_iota(jnp.int32, p.shape, 1)
    wreg = jnp.where(li < 80, W_ID,
                     jnp.where(li < 144, W_EXP,
                               jnp.where(li < 224, W_TEX, 0.0))).astype(f32)
    creg_loss = jnp.sum(wreg * p * p, axis=(0, 1), keepdims=True) / float(bs)
    gmask = jnp.logical_and(li >= 227, li < 254).astype(f32)
    gmean = jnp.sum(p * gmask, axis=1, keepdims=True) * (1.0 / 27.0)
    gd = (p - gmean) * gmask
    gamma_loss = jnp.sum(gd * gd, axis=(0, 1), keepdims=True) / float(bs * 27)

    # -- skin reflectance over texture (== albedo = (texBase@tex+meantex)/255) --
    skin = skin_ref[...]                                                          # [1, NV] f32
    msum = jnp.sum(skin, axis=(0, 1), keepdims=True)
    tmean = jnp.sum(alb * skin, axis=1, keepdims=True) / msum
    td = (alb - tmean) * skin
    refl_loss = jnp.sum(td * td, axis=(0, 1), keepdims=True) / (float(bs) * msum)

    if emit_mesh:
        nfp = adj_ref.shape[0]
        # edges directly from coefficients via the prefolded shape@edge basis:
        # differencing was done in f32 at build time (no bf16 cancellation).
        edges = jnp.dot(rcoef, sedge_ref[...], preferred_element_type=f32)        # [3bs, 2*NFP]
        e_nxt = roll_c(edges, 1)
        e_prv = roll_c(edges, 2)
        fnorm = (e_nxt[:, 0:nfp] * e_prv[:, nfp:2 * nfp]
                 - e_prv[:, 0:nfp] * e_nxt[:, nfp:2 * nfp])                       # cross(e1,e2)

        # vertex normals: adjacency-count matmul (f32) + rsqrt normalize (F.normalize)
        nsum = jnp.dot(fnorm, adj_ref[...].astype(f32), preferred_element_type=f32)
        nsq = nsum * nsum
        ss = nsq + roll_c(nsq, 1) + roll_c(nsq, 2)                                # |n|^2 per batch
        nrm = nsum * lax.rsqrt(jnp.maximum(ss, 1e-24))

        # SH lighting: 10 per-row scalar FMAs over rolled normal fields
        q = roll_c(nrm, 1)
        r = roll_c(nrm, 2)
        light = (k(0) + k(1) * nrm + k(2) * q + k(3) * r
                 + k(4) * (nrm * q) + k(5) * (q * r) + k(6) * (r * nrm)
                 + k(7) * (nrm * nrm) + k(8) * (q * q) + k(9) * (r * r))
        color_ref[...] = light * alb
        final_ref[...] = final

    # TODO(synk): soft-rasterizer renderer and InceptionResnetV1 feature net have
    # no Pallas equivalent; img_loss / feat_loss stay 0 (lanes 1 and 4).
    all_loss = (W_LM * lmk_loss + W_REG * creg_loss
                + W_GAMMA * gamma_loss + W_REFLC * refl_loss)

    lane = lax.broadcasted_iota(jnp.int32, (1, 128), 1)
    sel = lambda i: (lane == i).astype(f32)
    loss_ref[...] = (all_loss * sel(0) + lmk_loss * sel(2) + creg_loss * sel(3)
                     + gamma_loss * sel(5) + refl_loss * sel(6))


# ---------------- plain-JAX glue (tiny scalar/coefficient prep only) ----------------
def compute_rotation_matrix(angles):
    # standard BFM euler -> rotation: (Rz @ Ry @ Rx).permute(0, 2, 1)
    x, y, z = angles[:, 0], angles[:, 1], angles[:, 2]
    cx, sx = jnp.cos(x), jnp.sin(x)
    cy, sy = jnp.cos(y), jnp.sin(y)
    cz, sz = jnp.cos(z), jnp.sin(z)
    zeros, ones = jnp.zeros_like(x), jnp.ones_like(x)
    rx = jnp.stack([ones, zeros, zeros, zeros, cx, -sx, zeros, sx, cx], axis=-1).reshape(-1, 3, 3)
    ry = jnp.stack([cy, zeros, sy, zeros, ones, zeros, -sy, zeros, cy], axis=-1).reshape(-1, 3, 3)
    rz = jnp.stack([cz, -sz, zeros, sz, cz, zeros, zeros, zeros, ones], axis=-1).reshape(-1, 3, 3)
    rot = jnp.einsum("bij,bjk->bik", jnp.einsum("bij,bjk->bik", rz, ry), rx)
    return jnp.transpose(rot, (0, 2, 1))


def bfm_face_loss(params, gt_img, gt_lmk, bfm, return_mesh=False):
    bs = params.shape[0]
    rows = 3 * bs

    # split(params)
    id_coef = params[:, :80]
    ex_coef = params[:, 80:144]
    tex_coef = params[:, 144:224]
    angles = params[:, 224:227]
    gamma = params[:, 227:254]
    translation = params[:, 254:257]
    scale = params[:, 257:258]

    # rotation R (as used by bmm(shape, R)); rotT[b,i,c] = R[b,c,i]
    rot = compute_rotation_matrix(angles)                         # [bs,3,3]
    rotT = jnp.swapaxes(rot, 1, 2)

    # --- shape coefficients with rotation + mean folded (coordinate-major rows) ---
    idex = jnp.concatenate([id_coef, ex_coef], axis=1)            # [bs, 144]
    kse = idex.shape[1]
    rc = rotT[:, :, :, None] * idex[:, None, None, :]             # [b, i, c, k]
    rc = jnp.transpose(rc, (1, 0, 2, 3)).reshape(rows, 3 * kse)   # row i*bs+b, col c*K+k
    rc_mean = jnp.transpose(rotT, (1, 0, 2)).reshape(rows, 3)     # rotated-mean columns
    rcoef = jnp.concatenate([rc, rc_mean], axis=1)
    rcoef = jnp.pad(rcoef, ((0, 0), (0, SHAPE_K - 3 * kse - 3)))
    rcoef = rcoef.astype(jnp.bfloat16)                            # bf16 MXU LHS

    # --- block texture coefficients (albedo == texture/255, mean folded) ---
    eye3 = jnp.eye(3, dtype=jnp.float32)
    ac = eye3[None, :, :, None] * tex_coef[:, None, None, :]      # [b, c, c', k]
    ac = jnp.transpose(ac, (1, 0, 2, 3)).reshape(rows, 3 * N_TEX)
    acoef = jnp.concatenate([ac, jnp.repeat(eye3, bs, axis=0)], axis=1)
    acoef = jnp.pad(acoef, ((0, 0), (0, TEX_K - 3 * N_TEX - 3)))
    acoef = acoef.astype(jnp.bfloat16)

    # --- per-row scalars: SH lighting coefficients, pose, landmark sign ---
    init_light = jnp.zeros((9,), jnp.float32).at[0].set(0.8)
    g = gamma.reshape(bs, 3, 9) + init_light
    a1c1, a2c2, k6 = A1 * C1, A2 * C2, A2 * C2 * 0.5 / math.sqrt(3.0)
    sh_c = jnp.stack([
        g[..., 0] * (A0 * C0) - g[..., 6] * k6,   # const
        -g[..., 3] * a1c1,                        # * nx
        -g[..., 1] * a1c1,                        # * ny
        g[..., 2] * a1c1,                         # * nz
        g[..., 4] * a2c2,                         # * nx*ny
        -g[..., 5] * a2c2,                        # * ny*nz
        -g[..., 7] * a2c2,                        # * nx*nz
        0.5 * g[..., 8] * a2c2,                   # * nx^2
        -0.5 * g[..., 8] * a2c2,                  # * ny^2
        3.0 * g[..., 6] * k6,                     # * nz^2
    ], axis=-1)                                    # [bs, 3, 10]
    # permute so row (coord c) multiplies P=n_c, Q=n_{c+1}, R=n_{c+2} fields
    idx = np.array([[0, 1, 2, 3, 4, 5, 6, 7, 8, 9],
                    [0, 2, 3, 1, 5, 6, 4, 8, 9, 7],
                    [0, 3, 1, 2, 6, 4, 5, 9, 7, 8]], np.int32)
    kmat = sh_c[:, jnp.arange(3)[:, None], jnp.asarray(idx)]      # [bs, 3, 10]
    kmat = jnp.transpose(kmat, (1, 0, 2)).reshape(rows, 10)

    srow = jnp.tile(1.0 + scale[:, 0], 3).reshape(rows, 1)        # (1 + scale) per row
    trow = jnp.transpose(translation).reshape(rows, 1)            # translation per row
    sgn = jnp.asarray(np.repeat(np.array([1.0, -1.0, 0.0], np.float32), bs)).reshape(rows, 1)
    rowk = jnp.concatenate([kmat, srow, trow, sgn,
                            jnp.zeros((rows, 3), jnp.float32)], axis=1)   # [rows, 16]

    # --- ground-truth landmarks in the same coordinate-major layout ---
    gt = gt_lmk.astype(jnp.float32)
    gt_cm = jnp.transpose(gt, (2, 0, 1)).reshape(2 * bs, N_KP)
    gt_full = jnp.zeros((rows, LMK_PAD), jnp.float32).at[:2 * bs, :N_KP].set(gt_cm)

    kernel = functools.partial(_bfm_fused_kernel, return_mesh)
    loss_shape = jax.ShapeDtypeStruct((1, 128), jnp.float32)
    head_in = (rcoef, bfm["shape_blk"], acoef, bfm["tex_blk"])
    tail_in = (bfm["kp_sel"], rowk, gt_full, params, bfm["skin_mask"])

    if return_mesh:
        loss_vec, final_cm, color_cm = pl.pallas_call(
            kernel,
            out_shape=(loss_shape,
                       jax.ShapeDtypeStruct((rows, NV), jnp.float32),    # posed face shape
                       jax.ShapeDtypeStruct((rows, NV), jnp.float32)),   # lit vertex colors
        )(*head_in, bfm["shape_edge"], bfm["adj"], *tail_in)
    else:
        loss_vec = pl.pallas_call(kernel, out_shape=loss_shape)(*head_in, *tail_in)

    l = loss_vec[0]
    all_loss, img_loss, lmk_loss, creg_loss = l[0], l[1], l[2], l[3]
    feat_loss, gamma_loss, reflect_loss = l[4], l[5], l[6]

    # TODO(synk): soft-rasterizer renderer (sr.Mesh + parser.renderer) has no Pallas
    # equivalent; recon_img is a zero placeholder (img_loss/feat_loss = 0 above).
    recon_img = jnp.zeros((bs, 4, IMG_SIZE, IMG_SIZE), jnp.float32)
    del gt_img  # only consumed by the renderer / face_net branches above

    outs = (all_loss, img_loss, lmk_loss, creg_loss, feat_loss, gamma_loss,
            reflect_loss, recon_img)
    if return_mesh:
        face_shape = jnp.transpose(final_cm.reshape(3, bs, NV), (1, 2, 0))   # [bs, NV, 3]
        face_color = jnp.transpose(color_cm.reshape(3, bs, NV), (1, 2, 0))   # [bs, NV, 3]
        return outs + (face_shape, face_color)
    return outs


# ---------------- deterministic synthetic BFM model (pre-baked) ----------------
def build_bfm(key):
    # ---- grid-mesh topology (numpy, static) ----
    tris = []
    for i in range(GRID_H - 1):
        for j in range(GRID_W - 1):
            a = i * GRID_W + j
            b, c, d = a + 1, a + GRID_W, a + GRID_W + 1
            tris.append([a, b, c])
            tris.append([b, d, c])
    tri0 = np.array(tris, dtype=np.int32)                 # [NF, 3]
    nf = tri0.shape[0]                                    # 450
    face_id = tri0[:, ::-1]                               # torch.flip(tri - 1, dims=[1])

    # one-hot corner matrices, pre-differenced, zero-padded to NFP faces
    f1 = np.zeros((NV, NFP), np.float32); f1[face_id[:, 0], np.arange(nf)] = 1.0
    f2 = np.zeros((NV, NFP), np.float32); f2[face_id[:, 1], np.arange(nf)] = 1.0
    f3 = np.zeros((NV, NFP), np.float32); f3[face_id[:, 2], np.arange(nf)] = 1.0
    edge = np.concatenate([f1 - f2, f2 - f3], axis=1)     # [NV, 2*NFP]  (E1 | E2)

    # vertex <- face adjacency counts (8-slot point_buf semantics)
    adj_list = [[] for _ in range(NV)]
    for fi, (a, b, c) in enumerate(tri0):
        adj_list[a].append(fi); adj_list[b].append(fi); adj_list[c].append(fi)
    adj = np.zeros((NFP, NV), np.float32)
    for v, lst in enumerate(adj_list):
        for fi in lst[:8]:
            adj[fi, v] += 1.0

    keypoints = np.round(np.linspace(0, NV - 1, N_KP)).astype(np.int32)
    kp_sel = np.zeros((NV, LMK_PAD), np.float32)
    kp_sel[keypoints, np.arange(N_KP)] = 1.0

    skin_mask = ((np.arange(NV) % 3) != 0).astype(np.float32)[None, :]   # [1, NV]

    # ---- synthetic bases ----
    d3 = 3 * NV
    ks = jax.random.split(key, 5)
    idBase = 0.1 * jax.random.normal(ks[0], (N_ID, d3), jnp.float32)
    exBase = 0.1 * jax.random.normal(ks[1], (N_EX, d3), jnp.float32)
    texBase = 5.0 * jax.random.normal(ks[2], (N_TEX, d3), jnp.float32)
    meanshape = jax.random.normal(ks[3], (1, d3), jnp.float32)
    meantex = 128.0 + 20.0 * jax.random.normal(ks[4], (1, d3), jnp.float32)

    # ---- pre-baked coordinate-major basis blocks (z-flip, 1/255, means folded) ----
    flip = jnp.array([1.0, 1.0, -1.0], jnp.float32)
    kse = N_ID + N_EX
    sbase = jnp.concatenate([idBase, exBase], axis=0)                     # [144, 3NV]
    sbase = sbase.reshape(kse, NV, 3) * flip                              # z-flip baked
    sbase = jnp.transpose(sbase, (2, 0, 1)).reshape(3 * kse, NV)          # rows c*K+k
    smean = (meanshape.reshape(NV, 3) * flip).T                           # [3, NV]
    shape_blk = jnp.concatenate([sbase, smean], axis=0)                   # [435, NV]
    shape_blk = jnp.pad(shape_blk, ((0, SHAPE_K - 3 * kse - 3), (0, 0)))  # f32 [448, NV]

    # prefold shape-basis @ edge-difference topology (f32 differencing at build time)
    shape_edge = jnp.dot(shape_blk, jnp.asarray(edge))                    # [448, 2*NFP]

    tbase = (texBase / 255.0).reshape(N_TEX, NV, 3)
    tbase = jnp.transpose(tbase, (2, 0, 1)).reshape(3 * N_TEX, NV)
    tmean = (meantex / 255.0).reshape(NV, 3).T
    tex_blk = jnp.concatenate([tbase, tmean], axis=0)                     # [243, NV]
    tex_blk = jnp.pad(tex_blk, ((0, TEX_K - 3 * N_TEX - 3), (0, 0)))

    return dict(
        shape_blk=shape_blk.astype(jnp.bfloat16),    # [448, NV]    bf16
        shape_edge=shape_edge.astype(jnp.bfloat16),  # [448, 2*NFP] bf16 (prefolded)
        tex_blk=tex_blk.astype(jnp.bfloat16),        # [256, NV]    bf16
        adj=jnp.asarray(adj, jnp.bfloat16),          # [NFP, NV]    bf16 (exact counts)
        kp_sel=jnp.asarray(kp_sel, jnp.bfloat16),    # [NV, 128]    bf16 (exact 0/1)
        skin_mask=jnp.asarray(skin_mask),            # [1, NV]      f32
    )


if __name__ == "__main__":
    key = jax.random.PRNGKey(0)
    k_bfm, k_params, k_img, k_lmk = jax.random.split(key, 4)
    bfm = build_bfm(k_bfm)

    bs = 2
    params = 0.1 * jax.random.normal(k_params, (bs, N_PARAMS), jnp.float32)
    gt_img = jax.random.uniform(k_img, (bs, 3, IMG_SIZE, IMG_SIZE), jnp.float32)
    gt_lmk = jax.random.uniform(k_lmk, (bs, N_KP, 2), jnp.float32, 0.0, 250.0)

    # default (perf) path: loss-only, no mesh writeback
    fwd = jax.jit(functools.partial(bfm_face_loss, bfm=bfm))
    outs = jax.block_until_ready(fwd(params, gt_img, gt_lmk))
    assert bool(jnp.isfinite(outs[0])), "non-finite loss (loss-only path)"

    # full path: also materializes the mesh (posed vertices + lit vertex colors)
    fwd_mesh = jax.jit(functools.partial(bfm_face_loss, bfm=bfm, return_mesh=True))
    outs_m = jax.block_until_ready(fwd_mesh(params, gt_img, gt_lmk))
    assert bool(jnp.isfinite(outs_m[0])), "non-finite loss (mesh path)"
    assert bool(jnp.all(jnp.isfinite(outs_m[-2]))), "non-finite vertices"
    assert bool(jnp.all(jnp.isfinite(outs_m[-1]))), "non-finite vertex colors"

    print("KERNEL_OK")
</pallas_src>

<mosaic_0001>
module attributes {stable_mosaic.version = 11 : i64} {
  func.func @_bfm_fused_kernel(%arg0: memref<6x448xbf16, #tpu.memory_space<vmem>>, %arg1: memref<448x256xbf16, #tpu.memory_space<vmem>>, %arg2: memref<6x256xbf16, #tpu.memory_space<vmem>>, %arg3: memref<256x256xbf16, #tpu.memory_space<vmem>>, %arg4: memref<256x128xbf16, #tpu.memory_space<vmem>>, %arg5: memref<6x16xf32, #tpu.memory_space<vmem>>, %arg6: memref<6x128xf32, #tpu.memory_space<vmem>>, %arg7: memref<2x258xf32, #tpu.memory_space<vmem>>, %arg8: memref<1x256xf32, #tpu.memory_space<vmem>>, %arg9: memref<1x128xf32, #tpu.memory_space<vmem>>) attributes {dimension_semantics = [], scalar_prefetch = 0 : i64, scratch_operands = 0 : i64, tpu.core_type = #tpu.core_type<tc>} {
    %c0 = arith.constant 0 : index
    %c0_0 = arith.constant 0 : index
    %0 = vector.load %arg0[%c0, %c0_0] : memref<6x448xbf16, #tpu.memory_space<vmem>>, vector<6x448xbf16>
    %c0_1 = arith.constant 0 : index
    %c0_2 = arith.constant 0 : index
    %1 = vector.load %arg1[%c0_1, %c0_2] : memref<448x256xbf16, #tpu.memory_space<vmem>>, vector<448x256xbf16>
    %cst = arith.constant dense<0.000000e+00> : vector<6x256xf32>
    %2 = tpu.matmul %0, %1, %cst {dimension_numbers = #tpu.dot_dimension_numbers<[1], [0], [0], [1], [0, 0, 1, 1], [], []>} : vector<6x448xbf16>, vector<448x256xbf16>, vector<6x256xf32> -> vector<6x256xf32>
    %c0_3 = arith.constant 0 : index
    %c0_4 = arith.constant 0 : index
    %3 = vector.load %arg2[%c0_3, %c0_4] : memref<6x256xbf16, #tpu.memory_space<vmem>>, vector<6x256xbf16>
    %c0_5 = arith.constant 0 : index
    %c0_6 = arith.constant 0 : index
    %4 = vector.load %arg3[%c0_5, %c0_6] : memref<256x256xbf16, #tpu.memory_space<vmem>>, vector<256x256xbf16>
    %cst_7 = arith.constant dense<0.000000e+00> : vector<6x256xf32>
    %5 = tpu.matmul %3, %4, %cst_7 {dimension_numbers = #tpu.dot_dimension_numbers<[1], [0], [0], [1], [0, 0, 1, 1], [], []>} : vector<6x256xbf16>, vector<256x256xbf16>, vector<6x256xf32> -> vector<6x256xf32>
    %c0_8 = arith.constant 0 : index
    %c0_9 = arith.constant 0 : index
    %6 = vector.load %arg5[%c0_8, %c0_9] : memref<6x16xf32, #tpu.memory_space<vmem>>, vector<6x16xf32>
    %7 = vector.extract_strided_slice %6 {offsets = [0, 10], sizes = [6, 1], strides = [1, 1]} : vector<6x16xf32> to vector<6x1xf32>
    %8 = vector.broadcast %7 : vector<6x1xf32> to vector<6x256xf32>
    %9 = arith.mulf %8, %2 : vector<6x256xf32>
    %10 = vector.extract_strided_slice %6 {offsets = [0, 11], sizes = [6, 1], strides = [1, 1]} : vector<6x16xf32> to vector<6x1xf32>
    %11 = vector.broadcast %10 : vector<6x1xf32> to vector<6x256xf32>
    %12 = arith.addf %9, %11 : vector<6x256xf32>
    %c0_10 = arith.constant 0 : index
    %c0_11 = arith.constant 0 : index
    %13 = vector.load %arg4[%c0_10, %c0_11] : memref<256x128xbf16, #tpu.memory_space<vmem>>, vector<256x128xbf16>
    %14 = arith.extf %13 : vector<256x128xbf16> to vector<256x128xf32>
    %cst_12 = arith.constant dense<0.000000e+00> : vector<6x128xf32>
    %15 = tpu.matmul %12, %14, %cst_12 {dimension_numbers = #tpu.dot_dimension_numbers<[1], [0], [0], [1], [0, 0, 1, 1], [], []>} : vector<6x256xf32>, vector<256x128xf32>, vector<6x128xf32> -> vector<6x128xf32>
    %16 = vector.extract_strided_slice %6 {offsets = [0, 12], sizes = [6, 1], strides = [1, 1]} : vector<6x16xf32> to vector<6x1xf32>
    %17 = vector.broadcast %16 : vector<6x1xf32> to vector<6x128xf32>
    %18 = arith.mulf %17, %15 : vector<6x128xf32>
    %cst_13 = arith.constant 1.250000e+02 : f32
    %19 = vector.broadcast %cst_13 : f32 to vector<6x128xf32>
    %20 = arith.mulf %18, %19 : vector<6x128xf32>
    %cst_14 = arith.constant 1.250000e+02 : f32
    %21 = vector.broadcast %cst_14 : f32 to vector<6x128xf32>
    %22 = arith.addf %20, %21 : vector<6x128xf32>
    %23 = tpu.iota {dimensions = array<i32: 0>} : vector<6x128xi32>
    %24 = tpu.iota {dimensions = array<i32: 1>} : vector<6x128xi32>
    %c4_i32 = arith.constant 4 : i32
    %25 = vector.broadcast %c4_i32 : i32 to vector<6x128xi32>
    %26 = arith.cmpi slt, %23, %25 : vector<6x128xi32>
    %c68_i32 = arith.constant 68 : i32
    %27 = vector.broadcast %c68_i32 : i32 to vector<6x128xi32>
    %28 = arith.cmpi slt, %24, %27 : vector<6x128xi32>
    %29 = arith.andi %26, %28 : vector<6x128xi1>
    %30 = arith.extui %29 : vector<6x128xi1> to vector<6x128xi32>
    %31 = arith.sitofp %30 : vector<6x128xi32> to vector<6x128xf32>
    %c0_15 = arith.constant 0 : index
    %c0_16 = arith.constant 0 : index
    %32 = vector.load %arg6[%c0_15, %c0_16] : memref<6x128xf32, #tpu.memory_space<vmem>>, vector<6x128xf32>
    %33 = arith.subf %22, %32 : vector<6x128xf32>
    %34 = arith.mulf %33, %31 : vector<6x128xf32>
    %35 = math.absf %34 : vector<6x128xf32>
    %cst_17 = arith.constant 1.000000e+00 : f32
    %36 = vector.broadcast %cst_17 : f32 to vector<6x128xf32>
    %37 = arith.cmpf olt, %35, %36 : vector<6x128xf32>
    %cst_18 = arith.constant 5.000000e-01 : f32
    %38 = vector.broadcast %cst_18 : f32 to vector<6x128xf32>
    %39 = arith.mulf %38, %34 : vector<6x128xf32>
    %40 = arith.mulf %39, %34 : vector<6x128xf32>
    %cst_19 = arith.constant 5.000000e-01 : f32
    %41 = vector.broadcast %cst_19 : f32 to vector<6x128xf32>
    %42 = arith.subf %35, %41 : vector<6x128xf32>
    %43 = arith.select %37, %40, %42 : vector<6x128xi1>, vector<6x128xf32>
    %44 = vector.shape_cast %43 : vector<6x128xf32> to vector<1x6x128xf32>
    %cst_20 = arith.constant dense<0.000000e+00> : vector<1xf32>
    %45 = vector.multi_reduction <add>, %44, %cst_20 [1, 2] : vector<1x6x128xf32> to vector<1xf32>
    %46 = vector.shape_cast %45 : vector<1xf32> to vector<1x1x1xf32>
    %47 = vector.extract %46[0, 0, 0] : f32 from vector<1x1x1xf32>
    %48 = vector.broadcast %47 : f32 to vector<1x1xf32>
    %cst_21 = arith.constant 2.720000e+02 : f32
    %49 = vector.broadcast %cst_21 : f32 to vector<1x1xf32>
    %50 = arith.divf %48, %49 : vector<1x1xf32>
    %c0_22 = arith.constant 0 : index
    %c0_23 = arith.constant 0 : index
    %51 = vector.load %arg7[%c0_22, %c0_23] : memref<2x258xf32, #tpu.memory_space<vmem>>, vector<2x258xf32>
    %52 = tpu.iota {dimensions = array<i32: 1>} : vector<2x258xi32>
    %c80_i32 = arith.constant 80 : i32
    %53 = vector.broadcast %c80_i32 : i32 to vector<2x258xi32>
    %54 = arith.cmpi slt, %52, %53 : vector<2x258xi32>
    %c144_i32 = arith.constant 144 : i32
    %55 = vector.broadcast %c144_i32 : i32 to vector<2x258xi32>
    %56 = arith.cmpi slt, %52, %55 : vector<2x258xi32>
    %c224_i32 = arith.constant 224 : i32
    %57 = vector.broadcast %c224_i32 : i32 to vector<2x258xi32>
    %58 = arith.cmpi slt, %52, %57 : vector<2x258xi32>
    %cst_24 = arith.constant 1.700000e-02 : f32
    %cst_25 = arith.constant 0.000000e+00 : f32
    %59 = vector.broadcast %cst_24 : f32 to vector<2x258xf32>
    %60 = vector.broadcast %cst_25 : f32 to vector<2x258xf32>
    %61 = arith.select %58, %59, %60 : vector<2x258xi1>, vector<2x258xf32>
    %cst_26 = arith.constant 8.000000e-01 : f32
    %62 = vector.broadcast %cst_26 : f32 to vector<2x258xf32>
    %63 = arith.select %56, %62, %61 : vector<2x258xi1>, vector<2x258xf32>
    %cst_27 = arith.constant 1.000000e+00 : f32
    %64 = vector.broadcast %cst_27 : f32 to vector<2x258xf32>
    %65 = arith.select %54, %64, %63 : vector<2x258xi1>, vector<2x258xf32>
    %66 = arith.mulf %65, %51 : vector<2x258xf32>
    %67 = arith.mulf %66, %51 : vector<2x258xf32>
    %68 = vector.shape_cast %67 : vector<2x258xf32> to vector<1x2x258xf32>
    %cst_28 = arith.constant dense<0.000000e+00> : vector<1xf32>
    %69 = vector.multi_reduction <add>, %68, %cst_28 [1, 2] : vector<1x2x258xf32> to vector<1xf32>
    %70 = vector.shape_cast %69 : vector<1xf32> to vector<1x1x1xf32>
    %71 = vector.extract %70[0, 0, 0] : f32 from vector<1x1x1xf32>
    %72 = vector.broadcast %71 : f32 to vector<1x1xf32>
    %cst_29 = arith.constant 2.000000e+00 : f32
    %73 = vector.broadcast %cst_29 : f32 to vector<1x1xf32>
    %74 = arith.divf %72, %73 : vector<1x1xf32>
    %c227_i32 = arith.constant 227 : i32
    %75 = vector.broadcast %c227_i32 : i32 to vector<2x258xi32>
    %76 = arith.cmpi sge, %52, %75 : vector<2x258xi32>
    %c254_i32 = arith.constant 254 : i32
    %77 = vector.broadcast %c254_i32 : i32 to vector<2x258xi32>
    %78 = arith.cmpi slt, %52, %77 : vector<2x258xi32>
    %79 = arith.andi %76, %78 : vector<2x258xi1>
    %80 = arith.extui %79 : vector<2x258xi1> to vector<2x258xi32>
    %81 = arith.sitofp %80 : vector<2x258xi32> to vector<2x258xf32>
    %82 = arith.mulf %51, %81 : vector<2x258xf32>
    %cst_30 = arith.constant dense<0.000000e+00> : vector<2xf32>
    %83 = vector.multi_reduction <add>, %82, %cst_30 [1] : vector<2x258xf32> to vector<2xf32>
    %84 = vector.shape_cast %83 : vector<2xf32> to vector<2x1xf32>
    %cst_31 = arith.constant 0.0370370373 : f32
    %85 = vector.broadcast %cst_31 : f32 to vector<2x1xf32>
    %86 = arith.mulf %84, %85 : vector<2x1xf32>
    %87 = vector.broadcast %86 : vector<2x1xf32> to vector<2x258xf32>
    %88 = arith.subf %51, %87 : vector<2x258xf32>
    %89 = arith.mulf %88, %81 : vector<2x258xf32>
    %90 = arith.mulf %89, %89 : vector<2x258xf32>
    %91 = vector.shape_cast %90 : vector<2x258xf32> to vector<1x2x258xf32>
    %cst_32 = arith.constant dense<0.000000e+00> : vector<1xf32>
    %92 = vector.multi_reduction <add>, %91, %cst_32 [1, 2] : vector<1x2x258xf32> to vector<1xf32>
    %93 = vector.shape_cast %92 : vector<1xf32> to vector<1x1x1xf32>
    %94 = vector.extract %93[0, 0, 0] : f32 from vector<1x1x1xf32>
    %95 = vector.broadcast %94 : f32 to vector<1x1xf32>
    %cst_33 = arith.constant 5.400000e+01 : f32
    %96 = vector.broadcast %cst_33 : f32 to vector<1x1xf32>
    %97 = arith.divf %95, %96 : vector<1x1xf32>
    %c0_34 = arith.constant 0 : index
    %c0_35 = arith.constant 0 : index
    %98 = vector.load %arg8[%c0_34, %c0_35] : memref<1x256xf32, #tpu.memory_space<vmem>>, vector<1x256xf32>
    %99 = vector.shape_cast %98 : vector<1x256xf32> to vector<1x1x256xf32>
    %cst_36 = arith.constant dense<0.000000e+00> : vector<1xf32>
    %100 = vector.multi_reduction <add>, %99, %cst_36 [1, 2] : vector<1x1x256xf32> to vector<1xf32>
    %101 = vector.shape_cast %100 : vector<1xf32> to vector<1x1x1xf32>
    %102 = vector.extract %101[0, 0, 0] : f32 from vector<1x1x1xf32>
    %103 = vector.broadcast %102 : f32 to vector<1x1xf32>
    %104 = vector.broadcast %98 : vector<1x256xf32> to vector<6x256xf32>
    %105 = arith.mulf %5, %104 : vector<6x256xf32>
    %cst_37 = arith.constant dense<0.000000e+00> : vector<6xf32>
    %106 = vector.multi_reduction <add>, %105, %cst_37 [1] : vector<6x256xf32> to vector<6xf32>
    %107 = vector.shape_cast %106 : vector<6xf32> to vector<6x1xf32>
    %108 = vector.broadcast %103 : vector<1x1xf32> to vector<6x1xf32>
    %109 = arith.divf %107, %108 : vector<6x1xf32>
    %110 = vector.broadcast %109 : vector<6x1xf32> to vector<6x256xf32>
    %111 = arith.subf %5, %110 : vector<6x256xf32>
    %112 = vector.broadcast %98 : vector<1x256xf32> to vector<6x256xf32>
    %113 = arith.mulf %111, %112 : vector<6x256xf32>
    %114 = arith.mulf %113, %113 : vector<6x256xf32>
    %115 = vector.shape_cast %114 : vector<6x256xf32> to vector<1x6x256xf32>
    %cst_38 = arith.constant dense<0.000000e+00> : vector<1xf32>
    %116 = vector.multi_reduction <add>, %115, %cst_38 [1, 2] : vector<1x6x256xf32> to vector<1xf32>
    %117 = vector.shape_cast %116 : vector<1xf32> to vector<1x1x1xf32>
    %118 = vector.extract %117[0, 0, 0] : f32 from vector<1x1x1xf32>
    %119 = vector.broadcast %118 : f32 to vector<1x1xf32>
    %cst_39 = arith.constant 2.000000e+00 : f32
    %120 = vector.broadcast %cst_39 : f32 to vector<1x1xf32>
    %121 = arith.mulf %120, %103 : vector<1x1xf32>
    %122 = arith.divf %119, %121 : vector<1x1xf32>
    %cst_40 = arith.constant 1.600000e-03 : f32
    %123 = vector.broadcast %cst_40 : f32 to vector<1x1xf32>
    %124 = arith.mulf %123, %50 : vector<1x1xf32>
    %cst_41 = arith.constant 3.000000e-04 : f32
    %125 = vector.broadcast %cst_41 : f32 to vector<1x1xf32>
    %126 = arith.mulf %125, %74 : vector<1x1xf32>
    %127 = arith.addf %124, %126 : vector<1x1xf32>
    %cst_42 = arith.constant 1.000000e+01 : f32
    %128 = vector.broadcast %cst_42 : f32 to vector<1x1xf32>
    %129 = arith.mulf %128, %97 : vector<1x1xf32>
    %130 = arith.addf %127, %129 : vector<1x1xf32>
    %cst_43 = arith.constant 5.000000e+00 : f32
    %131 = vector.broadcast %cst_43 : f32 to vector<1x1xf32>
    %132 = arith.mulf %131, %122 : vector<1x1xf32>
    %133 = arith.addf %130, %132 : vector<1x1xf32>
    %134 = tpu.iota {dimensions = array<i32: 1>} : vector<1x128xi32>
    %c0_i32 = arith.constant 0 : i32
    %135 = vector.broadcast %c0_i32 : i32 to vector<1x128xi32>
    %136 = arith.cmpi eq, %134, %135 : vector<1x128xi32>
    %137 = arith.extui %136 : vector<1x128xi1> to vector<1x128xi32>
    %138 = arith.sitofp %137 : vector<1x128xi32> to vector<1x128xf32>
    %139 = vector.broadcast %133 : vector<1x1xf32> to vector<1x128xf32>
    %140 = arith.mulf %139, %138 : vector<1x128xf32>
    %c2_i32 = arith.constant 2 : i32
    %141 = vector.broadcast %c2_i32 : i32 to vector<1x128xi32>
    %142 = arith.cmpi eq, %134, %141 : vector<1x128xi32>
    %143 = arith.extui %142 : vector<1x128xi1> to vector<1x128xi32>
    %144 = arith.sitofp %143 : vector<1x128xi32> to vector<1x128xf32>
    %145 = vector.broadcast %50 : vector<1x1xf32> to vector<1x128xf32>
    %146 = arith.mulf %145, %144 : vector<1x128xf32>
    %147 = arith.addf %140, %146 : vector<1x128xf32>
    %c3_i32 = arith.constant 3 : i32
    %148 = vector.broadcast %c3_i32 : i32 to vector<1x128xi32>
    %149 = arith.cmpi eq, %134, %148 : vector<1x128xi32>
    %150 = arith.extui %149 : vector<1x128xi1> to vector<1x128xi32>
    %151 = arith.sitofp %150 : vector<1x128xi32> to vector<1x128xf32>
    %152 = vector.broadcast %74 : vector<1x1xf32> to vector<1x128xf32>
    %153 = arith.mulf %152, %151 : vector<1x128xf32>
    %154 = arith.addf %147, %153 : vector<1x128xf32>
    %c5_i32 = arith.constant 5 : i32
    %155 = vector.broadcast %c5_i32 : i32 to vector<1x128xi32>
    %156 = arith.cmpi eq, %134, %155 : vector<1x128xi32>
    %157 = arith.extui %156 : vector<1x128xi1> to vector<1x128xi32>
    %158 = arith.sitofp %157 : vector<1x128xi32> to vector<1x128xf32>
    %159 = vector.broadcast %97 : vector<1x1xf32> to vector<1x128xf32>
    %160 = arith.mulf %159, %158 : vector<1x128xf32>
    %161 = arith.addf %154, %160 : vector<1x128xf32>
    %c6_i32 = arith.constant 6 : i32
    %162 = vector.broadcast %c6_i32 : i32 to vector<1x128xi32>
    %163 = arith.cmpi eq, %134, %162 : vector<1x128xi32>
    %164 = arith.extui %163 : vector<1x128xi1> to vector<1x128xi32>
    %165 = arith.sitofp %164 : vector<1x128xi32> to vector<1x128xf32>
    %166 = vector.broadcast %122 : vector<1x1xf32> to vector<1x128xf32>
    %167 = arith.mulf %166, %165 : vector<1x128xf32>
    %168 = arith.addf %161, %167 : vector<1x128xf32>
    %c0_44 = arith.constant 0 : index
    %c0_45 = arith.constant 0 : index
    %169 = vector.load %arg9[%c0_44, %c0_45] : memref<1x128xf32, #tpu.memory_space<vmem>>, vector<1x128xf32>
    tpu.vector_store %arg9[%c0_44, %c0_45], %168 {strides = array<i32>} : memref<1x128xf32, #tpu.memory_space<vmem>>, vector<1x128xf32>,
    return
  }
}

</mosaic_0001>

<bundles_post_ra>
// kernel: tile.8
= control target key start
LH: loop header
LB: loop body
LE: loop exit
PB: predicated region body
PF: predicated region fallthrough
CT: control target
= control target key end

     0   :  { %s22_s0 = inlined_call_operand.vmem [shape: f32[2], index: 0, kind: input, shape index: {}]   ;;  %s23_s1 = inlined_call_operand.vmem [shape: f32[3,2], index: 1, kind: output, shape index: {}]  }
   0x1   :  { %v4_v0 = vld [vmem:[%s22_s0] ss:$0 sm:$0xff] }
   0x2   :  { %5 = vst [vmem:[%s23_s1] sm:$0xf] %v4_v0 }

// kernel: tile.0
= control target key start
LH: loop header
LB: loop body
LE: loop exit
PB: predicated region body
PF: predicated region fallthrough
CT: control target
= control target key end

     0   :  { %vm8_vm0 = vcmask 7168   ;;  %s38_s0 = inlined_call_operand.vmem [shape: f32[3,2], index: 0, kind: input, shape index: {}]   ;;  %s39_s1 = inlined_call_operand.vmem [shape: f32[6,1], index: 1, kind: output, shape index: {}]  }
   0x1   :  { %v5_v0 = vld [vmem:[%s38_s0] sm:$0xf]  ;;  %s18_s0 = smov 127  }
   0x2   :  { %6 = vst [vmem:[#allocation0] sm:$0xf] %v5_v0 }
   0x9   :  { %v10_v1 = vld [vmem:[#allocation0] sm:$0x7]  }
   0xa   :  { %v7_v2 = vld [vmem:[#allocation0] sm:$0x7]   ;;  %11 = vrot.lane.b32.xlu0 %v10_v1, %s18_s0 }
   0xb   :  { %9 = vst.msk [vmem:[%s39_s1] ss:$2 sm:$0x7] %vm8_vm0, %v7_v2  }
  0x7c   :  { %v12_v3 = vpop.permute.xlu0 %11  }
  0x7d   :  { %16 = vst.msk [vmem:[%s39_s1 + $0x1] ss:$2 sm:$0x7] %vm8_vm0, %v12_v3  }

// kernel: bfm_face_loss.1
= control target key start
LH: loop header
LB: loop body
LE: loop exit
PB: predicated region body
PF: predicated region fallthrough
CT: control target
= control target key end

     0   :  { %v1551_v1 = vmov 10   ;;  %vm384_vm0 = vcmask 523264   ;;  %v1552_v54 = vmov 11   ;;  %vm945_vm4 = vcmask 1041408   ;;  %s2035_s1 = inlined_call_operand.vmem [shape: bf16[448,256], index: 1, kind: input, shape index: {}]   ;;  %s2036_s0 = inlined_call_operand.vmem [shape: bf16[6,448], index: 0, kind: input, shape index: {}]   ;;  %s2037_s5 = inlined_call_operand.vmem [shape: f32[6,16], index: 5, kind: input, shape index: {}]   ;;  %s2038_s4 = inlined_call_operand.vmem [shape: bf16[256,128], index: 4, kind: input, shape index: {}]   ;;  %s2039_s3 = inlined_call_operand.vmem [shape: bf16[256,256], index: 3, kind: input, shape index: {}]   ;;  %s2040_s7 = inlined_call_operand.vmem [shape: f32[2,258], index: 7, kind: input, shape index: {}]   ;;  %s2041_s2 = inlined_call_operand.vmem [shape: bf16[6,256], index: 2, kind: input, shape index: {}]   ;;  %s2042_s6 = inlined_call_operand.vmem [shape: f32[6,128], index: 6, kind: input, shape index: {}]   ;;  %s2043_s8 = inlined_call_operand.vmem [shape: f32[1,256], index: 8, kind: input, shape index: {}]   ;;  %s2044_s9 = inlined_call_operand.vmem [shape: f32[1,128], index: 9, kind: output, shape index: {}]  }
   0x1   :  { %v1408_v0 = vld [vmem:[%s2035_s1 + $0x74] ss:$8 sps:$4 sm:$0xff]   ;;  %1404 = vset.pattern.permute.xlu0 %v1551_v1  ;;  %v1410_v2 = vld [vmem:[%s2035_s1 + $0x70] ss:$8 sps:$4 sm:$0xff]   ;;  %v1411_v3 = vld [vmem:[%s2035_s1 + $0x64] ss:$8 sps:$4 sm:$0xff]  }
   0x2   :  { %388 = vmatprep.subr.bf16.mxu0 %v1408_v0  ;;  %v1413_v4 = vld [vmem:[%s2035_s1 + $0x60] ss:$8 sps:$4 sm:$0xff]   ;;  %v1414_v5 = vld [vmem:[%s2035_s1 + $0x54] ss:$8 sps:$4 sm:$0xff]   ;;  %v1419_v7 = vld [vmem:[%s2035_s1 + $0x170] ss:$8 sps:$4 sm:$0xff]  }
   0x3   :  { %389 = vmatpush1.bf16.msra.mxu0 %v1410_v2  ;;  %v1417_v6 = vld [vmem:[%s2035_s1 + $0x174] ss:$8 sps:$4 sm:$0xff]   ;;  %v1416_v8 = vld [vmem:[%s2035_s1 + $0x50] ss:$8 sps:$4 sm:$0xff]   ;;  %v1423_v9 = vld [vmem:[%s2035_s1 + $0x164] ss:$8 sps:$4 sm:$0xff]  }
   0x4   :  { %390 = vmatprep.subr.bf16.mxu0 %v1411_v3  ;;  %429 = vmatprep.subr.bf16.mxu1 %v1417_v6  ;;  %v1425_v10 = vld [vmem:[%s2035_s1 + $0x160] ss:$8 sps:$4 sm:$0xff]   ;;  %v1420_v11 = vld [vmem:[%s2035_s1 + $0x44] ss:$8 sps:$4 sm:$0xff]   ;;  %v1429_v13 = vld [vmem:[%s2035_s1 + $0x154] ss:$8 sps:$4 sm:$0xff]  }
   0x5   :  { %430 = vmatpush1.bf16.msra.mxu1 %v1419_v7  ;;  %v1422_v12 = vld [vmem:[%s2035_s1 + $0x40] ss:$8 sps:$4 sm:$0xff]   ;;  %v1426_v14 = vld [vmem:[%s2035_s1 + $0x34] ss:$8 sps:$4 sm:$0xff]   ;;  %v1431_v15 = vld [vmem:[%s2035_s1 + $0x150] ss:$8 sps:$4 sm:$0xff]  }
   0x6   :  { %431 = vmatprep.subr.bf16.mxu1 %v1423_v9  ;;  %v1435_v16 = vld [vmem:[%s2035_s1 + $0x144] ss:$8 sps:$4 sm:$0xff]   ;;  %v1428_v17 = vld [vmem:[%s2035_s1 + $0x30] ss:$8 sps:$4 sm:$0xff]   ;;  %v1437_v19 = vld [vmem:[%s2035_s1 + $0x140] ss:$8 sps:$4 sm:$0xff]  }
   0x7   :  { %391 = vmatpush1.bf16.msra.mxu0 %v1413_v4  ;;  %v1432_v18 = vld [vmem:[%s2035_s1 + $0x24] ss:$8 sps:$4 sm:$0xff]   ;;  %v1441_v20 = vld [vmem:[%s2035_s1 + $0x134] ss:$8 sps:$4 sm:$0xff]   ;;  %v1434_v21 = vld [vmem:[%s2035_s1 + $0x20] ss:$8 sps:$4 sm:$0xff]  }
   0x8   :  { %392 = vmatprep.subr.bf16.mxu0 %v1414_v5  ;;  %v1438_v22 = vld [vmem:[%s2035_s1 + $0x14] ss:$8 sps:$4 sm:$0xff]   ;;  %v1443_v23 = vld [vmem:[%s2035_s1 + $0x130] ss:$8 sps:$4 sm:$0xff]   ;;  %v1447_v24 = vld [vmem:[%s2035_s1 + $0x124] ss:$8 sps:$4 sm:$0xff]  }
   0x9   :  { %432 = vmatpush1.bf16.msra.mxu1 %v1425_v10  ;;  %v1440_v25 = vld [vmem:[%s2035_s1 + $0x10] ss:$8 sps:$4 sm:$0xff]   ;;  %v1444_v26 = vld [vmem:[%s2035_s1 + $0x4] ss:$8 sps:$4 sm:$0xff]   ;;  %v1449_v27 = vld [vmem:[%s2035_s1 + $0x120] ss:$8 sps:$4 sm:$0xff]  }
   0xa   :  { %433 = vmatprep.subr.bf16.mxu1 %v1429_v13  ;;  %v1453_v28 = vld [vmem:[%s2035_s1 + $0x114] ss:$8 sps:$4 sm:$0xff]   ;;  %v1446_v29 = vld [vmem:[%s2035_s1] ss:$8 sps:$4 sm:$0xff]   ;;  %v1455_v31 = vld [vmem:[%s2035_s1 + $0x110] ss:$8 sps:$4 sm:$0xff]  }
   0xb   :  { %393 = vmatpush1.bf16.msra.mxu0 %v1416_v8  ;;  %v1450_v30 = vld [vmem:[%s2035_s1 + $0xf4] ss:$8 sps:$4 sm:$0xff]   ;;  %v1459_v32 = vld [vmem:[%s2035_s1 + $0x104] ss:$8 sps:$4 sm:$0xff]   ;;  %v1452_v33 = vld [vmem:[%s2035_s1 + $0xf0] ss:$8 sps:$4 sm:$0xff]  }
   0xc   :  { %394 = vmatprep.subr.bf16.mxu0 %v1420_v11  ;;  %v1456_v34 = vld [vmem:[%s2035_s1 + $0xe4] ss:$8 sps:$4 sm:$0xff]   ;;  %v1461_v35 = vld [vmem:[%s2035_s1 + $0x100] ss:$8 sps:$4 sm:$0xff]   ;;  %v1465_v36 = vld [vmem:[%s2035_s1 + $0x1b4] ss:$8 sps:$4 sm:$0xff]  }
   0xd   :  { %434 = vmatpush1.bf16.msra.mxu1 %v1431_v15  ;;  %v1458_v37 = vld [vmem:[%s2035_s1 + $0xe0] ss:$8 sps:$4 sm:$0xff]   ;;  %v1462_v38 = vld [vmem:[%s2035_s1 + $0xd4] ss:$8 sps:$4 sm:$0xff]   ;;  %v1467_v39 = vld [vmem:[%s2035_s1 + $0x1b0] ss:$8 sps:$4 sm:$0xff]  }
   0xe   :  { %435 = vmatprep.subr.bf16.mxu1 %v1435_v16  ;;  %v1471_v40 = vld [vmem:[%s2035_s1 + $0x1a4] ss:$8 sps:$4 sm:$0xff]   ;;  %v1464_v45 = vld [vmem:[%s2035_s1 + $0xd0] ss:$8 sps:$4 sm:$0xff]   ;;  %v1473_v46 = vld [vmem:[%s2035_s1 + $0x1a0] ss:$8 sps:$4 sm:$0xff]  }
   0xf   :  { %395 = vmatpush1.bf16.msra.mxu0 %v1422_v12  ;;  %v34_v41 = vld [vmem:[%s2036_s0 + $0x8] sm:$0x77]  ;;  %v33_v43 = vld [vmem:[%s2036_s0] sm:$0x77]  ;;  %v1477_v49 = vld [vmem:[%s2035_s1 + $0x194] ss:$8 sps:$4 sm:$0xff]  }
  0x10   :  { %396 = vmatprep.subr.bf16.mxu0 %v1426_v14  ;;  %v1173_v42 = vcombine.high %v34_v41, %v34_v41  ;;  %v1171_v44 = vcombine.high %v33_v43, %v33_v43  ;;  %v1743_v47 = vld [vmem:[%s2037_s5] sm:$0x3f]  ;;  %v1479_v51 = vld [vmem:[%s2035_s1 + $0x190] ss:$8 sps:$4 sm:$0xff]   ;;  %v1474_v52 = vld [vmem:[%s2035_s1 + $0xb4] ss:$8 sps:$4 sm:$0xff]   ;;  %v1172_v58 = vcombine.low %v34_v41, %v34_v41  ;;  %v1170_v3 = vcombine.low %v33_v43, %v33_v43 }
  0x11   :  { %436 = vmatpush1.bf16.msra.mxu1 %v1437_v19  ;;  %v1468_v48 = vld [vmem:[%s2035_s1 + $0xc4] ss:$8 sps:$4 sm:$0xff]   ;;  %714 = vperm.xlu0 %1404, %v1743_v47   ;;  %v1470_v50 = vld [vmem:[%s2035_s1 + $0xc0] ss:$8 sps:$4 sm:$0xff]   ;;  %v1476_v55 = vld [vmem:[%s2035_s1 + $0xb0] ss:$8 sps:$4 sm:$0xff]  }
  0x12   :  { %437 = vmatprep.subr.bf16.mxu1 %v1441_v20  ;;  %1230 = vmatprep.mubr.msk.bf16.mxu1 %vm384_vm0, %v1173_v42  ;;  %v1483_v53 = vld [vmem:[%s2035_s1 + $0x184] ss:$8 sps:$4 sm:$0xff]   ;;  %v1485_v56 = vld [vmem:[%s2035_s1 + $0x180] ss:$8 sps:$4 sm:$0xff]   ;;  %v1486_v60 = vld [vmem:[%s2035_s1 + $0x94] ss:$8 sps:$4 sm:$0xff]  }
  0x13   :  { %397 = vmatpush1.bf16.msra.mxu0 %v1428_v17  ;;  %420 = vmatprep.mubr.bf16.mxu0 %v1171_v44  ;;  %v1480_v57 = vld [vmem:[%s2035_s1 + $0xa4] ss:$8 sps:$4 sm:$0xff]   ;;  %v1482_v59 = vld [vmem:[%s2035_s1 + $0xa0] ss:$8 sps:$4 sm:$0xff]   ;;  %v1488_v61 = vld [vmem:[%s2035_s1 + $0x90] ss:$8 sps:$4 sm:$0xff]  }
  0x14   :  { %398 = vmatprep.subr.bf16.mxu0 %v1432_v18  ;;  %v1491_v62 = vld [vmem:[%s2035_s1 + $0x84] ss:$8 sps:$4 sm:$0xff]   ;;  %v1351_v63 = vld [vmem:[%s2038_s4 + $0x78] sm:$0xff]   ;;  %v1493_v0 = vld [vmem:[%s2035_s1 + $0x80] ss:$8 sps:$4 sm:$0xff]   ;;  %vm949_vm5 = vcmask 9216  }
  0x15   :  { %438 = vmatpush1.bf16.msra.mxu1 %v1443_v23  ;;  %1405 = vset.pattern.permute.xlu0 %v1552_v54  ;;  %v1336_v1 = vunpack.c.h.bf16 %v1351_v63  ;;  %v1343_v2 = vld [vmem:[%s2038_s4 + $0x38] sm:$0xff]   ;;  %v1350_v5 = vld [vmem:[%s2038_s4 + $0x70] sm:$0xff]   ;;  %v1335_v6 = vunpack.c.l.bf16 %v1351_v63  ;;  %v1349_v11 = vld [vmem:[%s2038_s4 + $0x68] sm:$0xff]   ;;  %vm1089_vm12 = vcmask 1040384   ;;  %vm884_vm14 = vcmask 1045504  }
  0x16   :  { %439 = vmatprep.subr.bf16.mxu1 %v1447_v24  ;;  %720 = vperm.xlu0 %1405, %v1743_v47   ;;  %v1304_v4 = vunpack.c.h.bf16 %v1343_v2  ;;  %v1342_v7 = vld [vmem:[%s2038_s4 + $0x30] sm:$0xff]   ;;  %v1303_v8 = vunpack.c.l.bf16 %v1343_v2  ;;  %v1332_v9 = vunpack.c.h.bf16 %v1350_v5  ;;  %v1331_v12 = vunpack.c.l.bf16 %v1350_v5  ;;  %v1341_v13 = vld [vmem:[%s2038_s4 + $0x28] sm:$0xff]   ;;  %v1348_v17 = vld [vmem:[%s2038_s4 + $0x60] sm:$0xff]  }
  0x17   :  { %399 = vmatpush1.bf16.msra.mxu0 %v1434_v21  ;;  %v1300_v10 = vunpack.c.h.bf16 %v1342_v7  ;;  %v1299_v14 = vunpack.c.l.bf16 %v1342_v7  ;;  %v1328_v15 = vunpack.c.h.bf16 %v1349_v11  ;;  %v1296_v16 = vunpack.c.h.bf16 %v1341_v13  ;;  %v1340_v19 = vld [vmem:[%s2038_s4 + $0x20] sm:$0xff]   ;;  %v1498_v54 = vld [vmem:[%s2039_s3 + $0x74] ss:$8 sps:$4 sm:$0xff]  }
  0x18   :  { %400 = vmatprep.subr.bf16.mxu0 %v1438_v22  ;;  %v1327_v18 = vunpack.c.l.bf16 %v1349_v11  ;;  %v1295_v20 = vunpack.c.l.bf16 %v1341_v13  ;;  %v1324_v21 = vunpack.c.h.bf16 %v1348_v17  ;;  %v1292_v22 = vunpack.c.h.bf16 %v1340_v19  ;;  %v1344_v43 = vld [vmem:[%s2038_s4 + $0x40] sm:$0xff]  }
  0x19   :  { %440 = vmatpush1.bf16.msra.mxu1 %v1449_v27  ;;  %v1323_v23 = vunpack.c.l.bf16 %v1348_v17  ;;  %v1291_v24 = vunpack.c.l.bf16 %v1340_v19  ;;  %v1308_v44 = vunpack.c.h.bf16 %v1344_v43  ;;  %v1505_v7 = vld [vmem:[%s2039_s3 + $0x40] ss:$8 sps:$4 sm:$0xff]  }
  0x1a   :  { %441 = vmatprep.subr.bf16.mxu1 %v1453_v28  ;;  %v1511_v19 = vld [vmem:[%s2039_s3 + $0x20] ss:$8 sps:$4 sm:$0xff]  }
  0x1b   :  { %401 = vmatpush1.bf16.msra.mxu0 %v1440_v25  ;;  %v1347_v25 = vld [vmem:[%s2038_s4 + $0x58] sm:$0xff]  }
  0x1c   :  { %402 = vmatprep.subr.bf16.mxu0 %v1444_v26  ;;  %v1339_v26 = vld [vmem:[%s2038_s4 + $0x18] sm:$0xff]   ;;  %v1320_v27 = vunpack.c.h.bf16 %v1347_v25 }
  0x1d   :  { %442 = vmatpush1.bf16.msra.mxu1 %v1455_v31  ;;  %v1288_v28 = vunpack.c.h.bf16 %v1339_v26  ;;  %v1346_v31 = vld [vmem:[%s2038_s4 + $0x50] sm:$0xff]  }
  0x1e   :  { %443 = vmatprep.subr.bf16.mxu1 %v1459_v32  ;;  %v1338_v32 = vld [vmem:[%s2038_s4 + $0x10] sm:$0xff]  }
  0x1f   :  { %403 = vmatpush1.bf16.msra.mxu0 %v1446_v29  ;;  %v1319_v29 = vunpack.c.l.bf16 %v1347_v25 }
  0x20   :  { %404 = vmatprep.subr.bf16.mxu0 %v1450_v30  ;;  %v1287_v30 = vunpack.c.l.bf16 %v1339_v26 }
  0x21   :  { %444 = vmatpush1.bf16.msra.mxu1 %v1461_v35  ;;  %v1315_v35 = vunpack.c.l.bf16 %v1346_v31 }
  0x22   :  { %453 = vmatprep.subr.bf16.mxu1 %v1465_v36  ;;  %v1283_v36 = vunpack.c.l.bf16 %v1338_v32 }
  0x23   :  { %405 = vmatpush2.bf16.msra.mxu0 %v1452_v33  ;;  %v1316_v33 = vunpack.c.h.bf16 %v1346_v31  ;;  %v1520_v31 = vld [vmem:[%s2039_s3 + $0xf0] ss:$8 sps:$4 sm:$0xff]  }
  0x24   :  { %406 = vmatprep.subr.bf16.mxu0 %v1456_v34  ;;  %v1284_v34 = vunpack.c.h.bf16 %v1338_v32  ;;  %v1525_v32 = vld [vmem:[%s2039_s3 + $0xe4] ss:$8 sps:$4 sm:$0xff]  }
  0x25   :  { %454 = vmatpush2.bf16.msra.mxu1 %v1467_v39  ;;  %v1337_v39 = vld [vmem:[%s2038_s4 + $0x8] sm:$0xff]  }
  0x26   :  { %455 = vmatprep.subr.bf16.mxu1 %v1471_v40  ;;  %v1280_v40 = vunpack.c.h.bf16 %v1337_v39  ;;  %v1279_v42 = vunpack.c.l.bf16 %v1337_v39  ;;  %v1532_v39 = vld [vmem:[%s2039_s3 + $0xb0] ss:$8 sps:$4 sm:$0xff]  }
  0x27   :  { %407 = vmatpush2.bf16.msra.mxu0 %v1458_v37  ;;  %v1345_v37 = vld [vmem:[%s2038_s4 + $0x48] sm:$0xff]  }
  0x28   :  { %408 = vmatprep.subr.bf16.mxu0 %v1462_v38  ;;  %v1312_v38 = vunpack.c.h.bf16 %v1345_v37  ;;  %v1311_v41 = vunpack.c.l.bf16 %v1345_v37  ;;  %v1529_v37 = vld [vmem:[%s2039_s3 + $0xc0] ss:$8 sps:$4 sm:$0xff]  }
  0x29   :  { %456 = vmatpush2.bf16.msra.mxu1 %v1473_v46 }
  0x2a   :  { %457 = vmatprep.subr.bf16.mxu1 %v1477_v49 }
  0x2b   :  { %409 = vmatpush2.bf16.msra.mxu0 %v1464_v45  ;;  %v1274_v45 = vld [vmem:[%s2038_s4] sm:$0xff]  }
  0x2c   :  { %410 = vmatprep.subr.bf16.mxu0 %v1468_v48  ;;  %v1276_v46 = vunpack.c.h.bf16 %v1274_v45  ;;  %v1307_v48 = vunpack.c.l.bf16 %v1344_v43  ;;  %v1275_v49 = vunpack.c.l.bf16 %v1274_v45  ;;  %v1543_v43 = vld [vmem:[%s2039_s3 + $0x84] ss:$8 sps:$4 sm:$0xff]  }
  0x2d   :  { %458 = vmatpush2.bf16.msra.mxu1 %v1479_v51  ;;  %v1496_v51 = vld [vmem:[%s2039_s3 + $0x70] ss:$8 sps:$4 sm:$0xff]  }
  0x2e   :  { %459 = vmatprep.subr.bf16.mxu1 %v1483_v53 }
  0x2f   :  { %411 = vmatpush2.bf16.msra.mxu0 %v1470_v50  ;;  %v866_v50 = vlaneseq }
  0x30   :  { %412 = vmatprep.subr.bf16.mxu0 %v1474_v52  ;;  %v1553_v52 = vmov 1983009808  }
  0x31   :  { %460 = vmatpush2.bf16.msra.mxu1 %v1485_v56  ;;  %v922_v53 = vunpack.c.l.s4 %v1553_v52  ;;  %v1845_v56 = vand.u32 127, %v866_v50 }
  0x32   :  { %670 = vmatprep.subr.bf16.mxu1 %v1498_v54 }
  0x33   :  { %413 = vmatpush2.bf16.msra.mxu0 %v1476_v55  ;;  %v1843_v55 = vshrl.u32 %v866_v50, 7  ;;  %vm901_vm7 = vcmp.lt.s32.totalorder %v1845_v56, 80  ;;  %vm871_vm10 = vcmp.lt.s32.totalorder %v1845_v56, 68  ;;  %vm1145_vm15 = vcmp.eq.s32.totalorder %v1845_v56, 2 }
  0x34   :  { %414 = vmatprep.subr.bf16.mxu0 %v1480_v57  ;;  %462 = vmatmul.mubr.bf16.vlgmr.msra.gmra.mxu1 %v1172_v58  ;;  %v1554_v57 = vmov 12   ;;  %v1501_v58 = vld [vmem:[%s2039_s3 + $0x64] ss:$8 sps:$4 sm:$0xff]   ;;  %vm1141_vm0 = vcmp.eq.s32.totalorder %v1845_v56, 0 }
  0x35   :  { %1406 = vset.pattern.permute.xlu1 %v1554_v57  ;;  %1407 = vset.pattern.permute.xlu0 %v1554_v57  ;;  %vm870_vm9 = vcmp.lt.s32.totalorder %v1843_v55, 4 }
  0x36   :  { %671 = vmatpush1.bf16.msra.mxu1 %v1496_v51  ;;  %vm872_vm11 = vmand %vm870_vm9, %vm871_vm10 }
  0x37   :  { %415 = vmatpush2.bf16.msra.mxu0 %v1482_v59  ;;  %v923_v59 = vunpack.c.0.s8 %v922_v53  ;;  %672 = vmatprep.subr.bf16.mxu1 %v1501_v58 }
  0x38   :  { %416 = vmatprep.subr.bf16.mxu0 %v1486_v60  ;;  %v1851_v60 = vadd.s32 128, %v1845_v56 }
  0x39   :  { %v1860_v63 = vsub.s32 %v923_v59, %v1843_v55 }
  0x3a   :  { %vm965_vm1 = vcmp.ge.s32.totalorder %v1851_v60, 227  ;;  %vm968_vm2 = vcmp.lt.s32.totalorder %v1851_v60, 254  ;;  %vm908_vm6 = vcmp.lt.s32.totalorder %v1851_v60, 224  ;;  %vm905_vm8 = vcmp.lt.s32.totalorder %v1851_v60, 144 }
  0x3b   :  { %417 = vmatpush2.bf16.msra.mxu0 %v1488_v61  ;;  %v1499_v61 = vld [vmem:[%s2039_s3 + $0x60] ss:$8 sps:$4 sm:$0xff]   ;;  %vm971_vm3 = vmand %vm965_vm1, %vm968_vm2  ;;  %vm1150_vm1 = vcmp.eq.s32.totalorder %v1845_v56, 3  ;;  %vm1155_vm2 = vcmp.eq.s32.totalorder %v1845_v56, 5 }
  0x3c   :  { %418 = vmatprep.subr.bf16.mxu0 %v1491_v62  ;;  %v1504_v62 = vld [vmem:[%s2039_s3 + $0x54] ss:$8 sps:$4 sm:$0xff]   ;;  %673 = vmatpush1.bf16.msra.mxu1 %v1499_v61 }
  0x3d   :  { %674 = vmatprep.subr.bf16.mxu1 %v1504_v62 }
  0x3f   :  { %419 = vmatpush2.bf16.msra.mxu0 %v1493_v0  ;;  %v1502_v0 = vld [vmem:[%s2039_s3 + $0x50] ss:$8 sps:$4 sm:$0xff]  }
  0x40   :  { %1352 = vmatprep.subr.mxu0 %v1336_v1  ;;  %v1555_v1 = vmov 0.0   ;;  %675 = vmatpush1.bf16.msra.mxu1 %v1502_v0 }
  0x41   :  { %v1267_v2 = vsel %vm971_vm3, 1.0, %v1555_v1  ;;  %v996_v5 = vrot.slane %v1555_v1, %v1860_v63  ;;  %vm1160_vm3 = vcmp.eq.s32.totalorder %v1845_v56, 6 }
  0x42   :  { %421 = vmatmul.mubr.bf16.vlgmr.msra.gmra.mxu0 %v1170_v3  ;;  %v1507_v3 = vld [vmem:[%s2039_s3 + $0x44] ss:$8 sps:$4 sm:$0xff]  }
  0x43   :  { %1353 = vmatpush3.msra.mxu0 %v1304_v4  ;;  %v982_v4 = vcombine.low %v1555_v1, %v1267_v2  ;;  %676 = vmatprep.subr.bf16.mxu1 %v1507_v3 }
  0x44   :  { %1354 = vmatprep.subr.mxu0 %v1335_v6  ;;  %677 = vmatpush1.bf16.msra.mxu1 %v1505_v7 }
  0x45   :  { %1355 = vmatpush3.msra.mxu0 %v1303_v8  ;;  %v989_v6 = vrot.slane %v982_v4, %v1860_v63  ;;  %v1881_v8 = vld [vmem:[%s2040_s7] sm:$0x3f]  ;;  %v1556_v4 = vmov 269488144  }
  0x46   :  { %1356 = vmatprep.subr.mxu0 %v1332_v9  ;;  %v1510_v9 = vld [vmem:[%s2039_s3 + $0x34] ss:$8 sps:$4 sm:$0xff]  }
  0x47   :  { %1357 = vmatpush3.msra.mxu0 %v1300_v10  ;;  %v1886_v10 = vcombine.low %v989_v6, %v996_v5  ;;  %678 = vmatprep.subr.bf16.mxu1 %v1510_v9  ;;  %v1030_v5 = vunpack.c.l.s4 %v1556_v4 }
  0x48   :  { %1358 = vmatprep.subr.mxu0 %v1331_v12  ;;  %v1508_v12 = vld [vmem:[%s2039_s3 + $0x30] ss:$8 sps:$4 sm:$0xff]  }
  0x49   :  { %1359 = vmatpush3.msra.mxu0 %v1299_v14  ;;  %v999_v11 = vmul.f32 %v1886_v10, %v1881_v8  ;;  %679 = vmatpush1.bf16.msra.mxu1 %v1508_v12  ;;  %v1031_v6 = vunpack.c.0.s8 %v1030_v5 }
  0x4a   :  { %1360 = vmatprep.subr.mxu0 %v1328_v15  ;;  %v1513_v15 = vld [vmem:[%s2039_s3 + $0x24] ss:$8 sps:$4 sm:$0xff]  }
  0x4b   :  { %1361 = vmatpush3.msra.mxu0 %v1296_v16  ;;  %v1001_v13 = vcombine.high %v999_v11, %v999_v11  ;;  %v1008_v14 = vrot.slane %v999_v11, %v1860_v63  ;;  %680 = vmatprep.subr.bf16.mxu1 %v1513_v15  ;;  %v1034_v9 = vsub.s32 %v1031_v6, %v1843_v55 }
  0x4c   :  { %1362 = vmatprep.subr.mxu0 %v1327_v18 }
  0x4d   :  { %1363 = vmatpush3.msra.mxu0 %v1295_v20  ;;  %v1015_v16 = vrot.slane %v1001_v13, %v1860_v63  ;;  %v1016_v17 = vcombine.high %v1008_v14, %v1008_v14  ;;  %v1020_v18 = vsel %vm945_vm4, %v1008_v14, 0.0  ;;  %681 = vmatpush1.bf16.msra.mxu1 %v1511_v19 }
  0x4e   :  { %1364 = vmatprep.subr.mxu0 %v1324_v21 }
  0x4f   :  { %1365 = vmatpush3.msra.mxu0 %v1292_v22  ;;  %v1021_v20 = vsel %vm945_vm4, %v1016_v17, 0.0  ;;  %v1023_v21 = vsel %vm949_vm5, %v1015_v16, 0.0  ;;  %v1516_v22 = vld [vmem:[%s2039_s3 + $0x14] ss:$8 sps:$4 sm:$0xff]  }
  0x50   :  { %1366 = vmatprep.subr.mxu0 %v1323_v23  ;;  %v1022_v23 = vadd.f32 %v1021_v20, %v1020_v18  ;;  %682 = vmatprep.subr.bf16.mxu1 %v1516_v22 }
  0x51   :  { %1367 = vmatpush3.msra.mxu0 %v1291_v24  ;;  %v470_v24 = vld [vmem:[%s2041_s2] sm:$0x77] }
  0x52   :  { %1368 = vmatprep.subr.mxu0 %v1320_v27  ;;  %v1232_v25 = vcombine.high %v470_v24, %v470_v24  ;;  %v1024_v26 = vadd.f32 %v1023_v21, %v1022_v23  ;;  %v1514_v27 = vld [vmem:[%s2039_s3 + $0x10] ss:$8 sps:$4 sm:$0xff]   ;;  %v1231_v45 = vcombine.low %v470_v24, %v470_v24  ;;  %v927_v24 = vrot.slane %v1881_v8, %v1860_v63 }
  0x53   :  { %1369 = vmatpush3.msra.mxu0 %v1288_v28  ;;  %v1519_v28 = vld [vmem:[%s2039_s3 + $0x4] ss:$8 sps:$4 sm:$0xff]   ;;  %683 = vmatpush1.bf16.msra.mxu1 %v1514_v27  ;;  %v1557_v27 = vmov 0.8  }
  0x54   :  { %1370 = vmatprep.subr.mxu0 %v1319_v29  ;;  %702 = vmatprep.mubr.bf16.mxu1 %v1232_v25  ;;  %v1517_v29 = vld [vmem:[%s2039_s3] ss:$8 sps:$4 sm:$0xff]  }
  0x55   :  { %1371 = vmatpush3.msra.mxu0 %v1287_v30  ;;  %1025 = vadd.xlane.f32.xlu1 %v1024_v26  ;;  %v1522_v30 = vld [vmem:[%s2039_s3 + $0xf4] ss:$8 sps:$4 sm:$0xff]  }
  0x56   :  { %1372 = vmatprep.subr.mxu0 %v1316_v33  ;;  %684 = vmatprep.subr.bf16.mxu1 %v1519_v28  ;;  %v1523_v33 = vld [vmem:[%s2039_s3 + $0xe0] ss:$8 sps:$4 sm:$0xff]   ;;  %v916_v28 = vsel %vm901_vm7, 1.0, %v1557_v27 }
  0x57   :  { %1373 = vmatpush3.msra.mxu0 %v1284_v34  ;;  %685 = vmatpush1.bf16.msra.mxu1 %v1517_v29  ;;  %v1528_v34 = vld [vmem:[%s2039_s3 + $0xd4] ss:$8 sps:$4 sm:$0xff]   ;;  %v920_v29 = vcombine.high %v1881_v8, %v1881_v8 }
  0x58   :  { %1374 = vmatprep.subr.mxu0 %v1315_v35  ;;  %686 = vmatprep.subr.bf16.mxu1 %v1522_v30  ;;  %v1526_v35 = vld [vmem:[%s2039_s3 + $0xd0] ss:$8 sps:$4 sm:$0xff]   ;;  %v935_v30 = vcombine.high %v927_v24, %v927_v24 }
  0x59   :  { %1375 = vmatpush3.msra.mxu0 %v1283_v36  ;;  %v1531_v36 = vld [vmem:[%s2039_s3 + $0xc4] ss:$8 sps:$4 sm:$0xff]  }
  0x5a   :  { %1376 = vmatprep.subr.mxu0 %v1312_v38  ;;  %v1534_v38 = vld [vmem:[%s2039_s3 + $0xb4] ss:$8 sps:$4 sm:$0xff]  }
  0x5b   :  { %1377 = vmatpush3.msra.mxu0 %v1280_v40  ;;  %687 = vmatpush2.bf16.msra.mxu1 %v1520_v31  ;;  %v1535_v40 = vld [vmem:[%s2039_s3 + $0xa0] ss:$8 sps:$4 sm:$0xff]   ;;  %v939_v31 = vmul.f32 %v927_v24, %v916_v28 }
  0x5c   :  { %1378 = vmatprep.subr.mxu0 %v1311_v41  ;;  %688 = vmatprep.subr.bf16.mxu1 %v1525_v32  ;;  %v1540_v41 = vld [vmem:[%s2039_s3 + $0x94] ss:$8 sps:$4 sm:$0xff]   ;;  %v934_v32 = vrot.slane %v920_v29, %v1860_v63 }
  0x5d   :  { %1379 = vmatpush3.msra.mxu0 %v1279_v42  ;;  %v1538_v42 = vld [vmem:[%s2039_s3 + $0x90] ss:$8 sps:$4 sm:$0xff]  }
  0x5e   :  { %1380 = vmatprep.subr.mxu0 %v1308_v44  ;;  %v1541_v44 = vld [vmem:[%s2039_s3 + $0x80] ss:$8 sps:$4 sm:$0xff]  }
  0x5f   :  { %1381 = vmatpush3.msra.mxu0 %v1276_v46  ;;  %689 = vmatpush2.bf16.msra.mxu1 %v1523_v33 }
  0x60   :  { %1382 = vmatprep.subr.mxu0 %v1307_v48  ;;  %690 = vmatprep.subr.bf16.mxu1 %v1528_v34  ;;  %v942_v34 = vmul.f32 %v939_v31, %v927_v24 }
  0x61   :  { %1383 = vmatpush3.msra.mxu0 %v1275_v49 }
  0x63   :  { %691 = vmatpush2.bf16.msra.mxu1 %v1526_v35  ;;  %v941_v35 = vmul.f32 0.0, %v934_v32 }
  0x64   :  { %692 = vmatprep.subr.bf16.mxu1 %v1531_v36 }
  0x65   :  { %v944_v60 = vmul.f32 %v941_v35, %v934_v32 }
  0x66   :  { %860 = vperm.xlu1 %1406, %v1743_v47   ;;  %v1537_v47 = vld [vmem:[%s2039_s3 + $0xa4] ss:$8 sps:$4 sm:$0xff]  }
  0x67   :  { %693 = vmatpush2.bf16.msra.mxu1 %v1529_v37  ;;  %v946_v37 = vsel %vm945_vm4, %v942_v34, 0.0 }
  0x68   :  { %694 = vmatprep.subr.bf16.mxu1 %v1534_v38 }
  0x6b   :  { %695 = vmatpush2.bf16.msra.mxu1 %v1532_v39 }
  0x6c   :  { %696 = vmatprep.subr.bf16.mxu1 %v1537_v47  ;;  %v950_v47 = vsel %vm949_vm5, %v944_v60, 0.0 }
  0x6f   :  { %697 = vmatpush2.bf16.msra.mxu1 %v1535_v40 }
  0x70   :  { %698 = vmatprep.subr.bf16.mxu1 %v1540_v41 }
  0x73   :  { %699 = vmatpush2.bf16.msra.mxu1 %v1538_v42 }
  0x74   :  { %700 = vmatprep.subr.bf16.mxu1 %v1543_v43 }
  0x77   :  { %701 = vmatpush2.bf16.msra.mxu1 %v1541_v44 }
  0x7a   :  { %703 = vmatmul.mubr.bf16.vlgmr.msra.gmra.mxu1 %v1231_v45 }
  0x8c   :  { %v715_v51 = vpop.permute.xlu0 %714 }
  0x91   :  { %v721_v62 = vpop.permute.xlu0 %720 }
  0xde   :  { %v1026_v7 = vpop.xlane.xlu1 %1025 }
  0xdf   :  { %v1027_v11 = vmul.f32 0.037037037, %v1026_v7 }
  0xe1   :  { %v1035_v12 = vrot.slane %v1027_v11, %v1034_v9 }
  0xe2   :  { %v861_v45 = vpop.permute.xlu1 %860 }
  0xe3   :  { %v1037_v13 = vsub.f32 %v1881_v8, %v1035_v12 }
  0xe5   :  { %v1038_v14 = vmul.f32 %v1037_v13, %v1886_v10  ;;  %v911_v10 = vsel %vm908_vm6, 0.017, %v1555_v1 }
  0xe6   :  { %v914_v26 = vsel %vm905_vm8, 0.8, %v911_v10 }
  0xe7   :  { %v1039_v15 = vmul.f32 %v1038_v14, %v1038_v14  ;;  %v940_v33 = vmul.f32 %v935_v30, %v914_v26 }
  0xe9   :  { %v1048_v16 = vrot.slane %v1039_v15, %v1860_v63  ;;  %v1041_v17 = vcombine.high %v1039_v15, %v1039_v15  ;;  %v943_v36 = vmul.f32 %v940_v33, %v935_v30 }
  0xeb   :  { %v1056_v18 = vcombine.high %v1048_v16, %v1048_v16  ;;  %v1055_v19 = vrot.slane %v1041_v17, %v1860_v63  ;;  %v1060_v20 = vsel %vm945_vm4, %v1048_v16, 0.0  ;;  %v947_v38 = vsel %vm945_vm4, %v943_v36, 0.0 }
  0xec   :  { %v948_v39 = vadd.f32 %v947_v38, %v946_v37 }
  0xed   :  { %v1061_v21 = vsel %vm945_vm4, %v1056_v18, 0.0  ;;  %v1063_v23 = vsel %vm949_vm5, %v1055_v19, 0.0 }
  0xee   :  { %v1062_v22 = vadd.f32 %v1061_v21, %v1060_v20  ;;  %v951_v40 = vadd.f32 %v950_v47, %v948_v39 }
  0xf0   :  { %v1064_v25 = vadd.f32 %v1063_v23, %v1062_v22  ;;  %952 = vadd.xlane.f32.xlu1 %v951_v40 }
  0xf2   :  { %1065 = vadd.xlane.f32.xlu0 %v1064_v25 }
  0xf4   :  { %v463_v46 = vpop.f32.mrf.mxu1 }
  0xf6   :  { %v465_v48 = vpop.f32.mrf.mxu1 }
  0xf8   :  { %v467_v49 = vpop.f32.mrf.mxu1 }
  0xfa   :  { %v468_v50 = vpop.f32.mrf.mxu1 }
  0xfb   :  { %v875_v50 = vld [vmem:[%s2042_s6] sm:$0x3f] }
 0x102   :  { %v422_v52 = vpop.f32.mrf.mxu0 }
 0x103   :  { %v464_v53 = vadd.f32 %v463_v46, %v422_v52  ;;  %v1265_v52 = vsel %vm872_vm11, 1.0, %v1555_v1 }
 0x104   :  { %v424_v54 = vpop.f32.mrf.mxu0 }
 0x105   :  { %v466_v57 = vadd.f32 %v465_v48, %v424_v54  ;;  %v717_v58 = vmul.f32 %v715_v51, %v464_v53  ;;  %v1081_v53 = vsub.s32 0, %v1843_v55  ;;  %v1085_v54 = vsub.s32 1, %v1843_v55 }
 0x106   :  { %v426_v59 = vpop.f32.mrf.mxu0 }
 0x107   :  { %v718_v61 = vmul.f32 %v715_v51, %v466_v57  ;;  %v723_v3 = vadd.f32 %v721_v62, %v717_v58  ;;  %v1077_v58 = vld [vmem:[%s2043_s8] sm:$0x3] }
 0x108   :  { %v427_v0 = vpop.f32.mrf.mxu0 }
 0x109   :  { %v724_v2 = vadd.f32 %v721_v62, %v718_v61  ;;  %v2003_v61 = vrot.slane %v1077_v58, %v1081_v53  ;;  %v2005_v62 = vrot.slane %v1077_v58, %v1085_v54 }
 0x10b   :  { %853 = vmatprep.mubr.f32.mxu0 %v724_v2  ;;  %v1090_v5 = vsel %vm1089_vm12, %v2003_v61, 0.0  ;;  %v1091_v55 = vsel %vm1089_vm12, %v2005_v62, 0.0 }
 0x10c   :  { %854 = vmatmul.mubr.f32.vlgmr.msra.gmra.mxu0 %v723_v3  ;;  %v1092_v12 = vadd.f32 %v1091_v55, %v1090_v5 }
 0x13a   :  { %v1988_v41 = vpop.f32.mrf.mxu1 }
 0x13b   :  { %v1103_v6 = vmul.f32 %v2003_v61, %v1988_v41 }
 0x13c   :  { %v1990_v8 = vpop.f32.mrf.mxu1 }
 0x13d   :  { %v1104_v7 = vmul.f32 %v2005_v62, %v1990_v8  ;;  %v1105_v13 = vsel %vm884_vm14, %v1103_v6, 0.0 }
 0x13e   :  { %v708_v42 = vpop.f32.mrf.mxu1 }
 0x13f   :  { %v1106_v14 = vsel %vm884_vm14, %v1104_v7, 0.0 }
 0x140   :  { %v709_v63 = vpop.f32.mrf.mxu1  ;;  %v1107_v15 = vadd.f32 %v1106_v14, %v1105_v13 }
 0x179   :  { %v953_v16 = vpop.xlane.xlu1 %952 }
 0x17a   :  { %v954_v18 = vrot.slane %v953_v16, 4 }
 0x17b   :  { %v1066_v17 = vpop.xlane.xlu0 %1065 }
 0x17c   :  { %v1067_v19 = vrot.slane %v1066_v17, 4  ;;  %v955_v20 = vadd.f32 %v954_v18, %v953_v16  ;;  %v1269_v18 = vsel %vm1145_vm15, 1.0, %v1555_v1 }
 0x17e   :  { %v1068_v21 = vadd.f32 %v1067_v19, %v1066_v17  ;;  %v956_v22 = vrot.slane %v955_v20, 2  ;;  %v1268_v19 = vsel %vm1141_vm0, 1.0, %v1555_v1 }
 0x180   :  { %v1069_v24 = vrot.slane %v1068_v21, 2  ;;  %v957_v26 = vadd.f32 %v956_v22, %v955_v20 }
 0x182   :  { %v1070_v30 = vadd.f32 %v1069_v24, %v1068_v21  ;;  %v958_v33 = vrot.slane %v957_v26, 1  ;;  %v1270_v21 = vsel %vm1150_vm1, 1.0, %v1555_v1  ;;  %v1271_v24 = vsel %vm1155_vm2, 1.0, %v1555_v1 }
 0x184   :  { %v1071_v36 = vrot.slane %v1070_v30, 1  ;;  %v959_v38 = vadd.f32 %v958_v33, %v957_v26  ;;  %v1272_v26 = vsel %vm1160_vm3, 1.0, %v1555_v1 }
 0x186   :  { %v1072_v39 = vadd.f32 %v1071_v36, %v1070_v30 }
 0x1cc   :  { %v1384_v43 = vpop.f32.mrf.mxu0 }
 0x1ce   :  { %v1385_v44 = vpop.f32.mrf.mxu0 }
 0x1cf   :  { %v1386_v46 = vadd.f32 %v1385_v44, %v1384_v43 }
 0x1d1   :  { %v863_v48 = vmul.f32 %v1386_v46, %v861_v45 }
 0x1d3   :  { %v864_v49 = vmul.f32 125.0, %v863_v48 }
 0x1d5   :  { %v865_v51 = vadd.f32 125.0, %v864_v49 }
 0x1d7   :  { %v876_v57 = vsub.f32 %v865_v51, %v875_v50 }
 0x1d9   :  { %v877_v59 = vmul.f32 %v1265_v52, %v876_v57 }
 0x1db   :  { %v878_v0 = vand.u32 2147483647, %v877_v59  ;;  %v880_v2 = vmul.f32 0.5, %v877_v59 }
 0x1dd   :  { %vm879_vm13 = vcmp.lt.f32.partialorder %v878_v0, 1.0  ;;  %v881_v3 = vmul.f32 %v880_v2, %v877_v59  ;;  %v1266_v4 = vadd.f32 -0.5, %v878_v0 }
 0x1df   :  { %v883_v9 = vsel %vm879_vm13, %v881_v3, %v1266_v4 }
 0x1e0   :  { %v885_v11 = vsel %vm884_vm14, %v883_v9, 0.0 }
 0x1e1   :  { %886 = vadd.xlane.f32.xlu0 %v885_v11 }
 0x1e5   :  { %1093 = vadd.xlane.f32.xlu0 %v1092_v12 }
 0x1e9   :  { %1108 = vadd.xlane.f32.xlu0 %v1107_v15 }
 0x26a   :  { %v887_v23 = vpop.xlane.xlu0 %886 }
 0x26b   :  { %v888_v25 = vrot.slane %v887_v23, 4 }
 0x26d   :  { %v889_v10 = vadd.f32 %v888_v25, %v887_v23 }
 0x26e   :  { %v1094_v27 = vpop.xlane.xlu0 %1093 }
 0x26f   :  { %v890_v28 = vrot.slane %v889_v10, 2  ;;  %v1095_v29 = vrot.slane %v1094_v27, 4 }
 0x271   :  { %v1096_v31 = vadd.f32 %v1095_v29, %v1094_v27  ;;  %v891_v32 = vadd.f32 %v890_v28, %v889_v10 }
 0x272   :  { %v1109_v57 = vpop.xlane.xlu0 %1108 }
 0x273   :  { %v1097_v34 = vrot.slane %v1096_v31, 2  ;;  %v892_v35 = vrot.slane %v891_v32, 1 }
 0x275   :  { %v893_v37 = vadd.f32 %v892_v35, %v891_v32  ;;  %v1098_v60 = vadd.f32 %v1097_v34, %v1096_v31 }
 0x277   :  { %1387 = vpush %v893_v37  ;;  %v1099_v47 = vrot.slane %v1098_v60, 1 }
 0x278   :  { %1389 = vpush %v959_v38 }
 0x279   :  { %1391 = vpush %v1072_v39  ;;  %v1100_v40 = vadd.f32 %v1099_v47, %v1098_v60 }
 0x27b   :  { %1393 = vpush %v1100_v40 }
 0x2a8   :  { %s1388_s6 = spop %1387 }
 0x2a9   :  { %v895_v42 = vstv %s1388_s6  ;;  %s1390_s8 = spop %1389 }
 0x2aa   :  { %v897_v63 = vmul.f32 0.0036764706, %v895_v42  ;;  %v961_v43 = vstv %s1390_s8  ;;  %s1392_s19 = spop %1391 }
 0x2ab   :  { %v963_v44 = vmul.f32 0.5, %v961_v43  ;;  %v1074_v45 = vstv %s1392_s19 }
 0x2ac   :  { %v1134_v46 = vmul.f32 0.0016, %v897_v63  ;;  %v1076_v48 = vmul.f32 0.018518519, %v1074_v45  ;;  %s1394_s5 = spop %1393  ;;  %v1148_v22 = vmul.f32 %v1269_v18, %v897_v63 }
 0x2ad   :  { %v1135_v49 = vmul.f32 0.0003, %v963_v44  ;;  %v1102_v50 = vstv %s1394_s5  ;;  %v1153_v25 = vmul.f32 %v1270_v21, %v963_v44 }
 0x2ae   :  { %1547 = vrcp.f32 %v1102_v50  ;;  %v1137_v52 = vmul.f32 10.0, %v1076_v48  ;;  %v1158_v27 = vmul.f32 %v1271_v24, %v1076_v48 }
 0x2af   :  { %v1136_v51 = vadd.f32 %v1135_v49, %v1134_v46 }
 0x2b1   :  { %v1138_v53 = vadd.f32 %v1137_v52, %v1136_v51 }
 0x2bb   :  { %v1548_v54 = vpop.eup %1547 }
 0x2bc   :  { %v1111_v58 = vmul.f32 %v1548_v54, %v1109_v57 }
 0x2be   :  { %v1112_v59 = vsub.f32 %v1988_v41, %v1111_v58  ;;  %v1113_v0 = vsub.f32 %v1990_v8, %v1111_v58  ;;  %v1131_v8 = vmul.f32 2.0, %v1102_v50 }
 0x2c0   :  { %v1114_v2 = vmul.f32 %v1112_v59, %v2003_v61  ;;  %v1115_v3 = vmul.f32 %v1113_v0, %v2005_v62  ;;  %1549 = vrcp.f32 %v1131_v8 }
 0x2c2   :  { %v1116_v4 = vmul.f32 %v1114_v2, %v1114_v2  ;;  %v1117_v5 = vmul.f32 %v1115_v3, %v1115_v3 }
 0x2c4   :  { %v1118_v55 = vsel %vm884_vm14, %v1116_v4, 0.0  ;;  %v1119_v6 = vsel %vm884_vm14, %v1117_v5, 0.0 }
 0x2c5   :  { %v1120_v7 = vadd.f32 %v1119_v6, %v1118_v55 }
 0x2c7   :  { %1121 = vadd.xlane.f32.xlu0 %v1120_v7 }
 0x2cd   :  { %v1550_v61 = vpop.eup %1549 }
 0x350   :  { %v1122_v9 = vpop.xlane.xlu0 %1121 }
 0x351   :  { %v1123_v11 = vrot.slane %v1122_v9, 4 }
 0x353   :  { %v1124_v12 = vadd.f32 %v1123_v11, %v1122_v9 }
 0x355   :  { %v1125_v13 = vrot.slane %v1124_v12, 2 }
 0x357   :  { %v1126_v14 = vadd.f32 %v1125_v13, %v1124_v12 }
 0x359   :  { %v1127_v41 = vrot.slane %v1126_v14, 1 }
 0x35b   :  { %v1128_v15 = vadd.f32 %v1127_v41, %v1126_v14 }
 0x35d   :  { %1395 = vpush %v1128_v15 }
 0x38e   :  { %s1396_s20 = spop %1395 }
 0x38f   :  { %v1130_v62 = vstv %s1396_s20 }
 0x390   :  { %v1133_v16 = vmul.f32 %v1550_v61, %v1130_v62 }
 0x392   :  { %v1139_v17 = vmul.f32 5.0, %v1133_v16  ;;  %v1163_v30 = vmul.f32 %v1272_v26, %v1133_v16 }
 0x394   :  { %v1140_v20 = vadd.f32 %v1139_v17, %v1138_v53 }
 0x396   :  { %v1144_v23 = vmul.f32 %v1268_v19, %v1140_v20 }
 0x398   :  { %v1149_v10 = vadd.f32 %v1148_v22, %v1144_v23 }
 0x39a   :  { %v1154_v28 = vadd.f32 %v1153_v25, %v1149_v10 }
 0x39c   :  { %v1159_v29 = vadd.f32 %v1158_v27, %v1154_v28 }
 0x39e   :  { %v1164_v31 = vadd.f32 %v1163_v30, %v1159_v29 }
 0x3a0   :  { %1165 = vst [vmem:[%s2044_s9] sm:$0x1] %v1164_v31 }

</bundles_post_ra>
